<compile_context>
chip_gen: v7x
topology: tpu7x:2x2x1
jax: 0.10.0
libtpu: 0.0.40
codegen_flags: <defaults>
</compile_context>

<pallas_src>
import jax
import jax.numpy as jnp
from jax import lax
from jax.experimental import pallas as pl
from jax.experimental.pallas import tpu as pltpu


# --------------------------------------------------------------------------- #
# Kernel: one (batch, spatial-tile) block per grid step.
# --------------------------------------------------------------------------- #
def _downsample_kernel(cp_ref, w_ref, b_ref, z_ref, out_ref):
    """
    cp_ref : (1, TILE, 9*Cin)   im2col patches (bf16 or f32)
    w_ref  : (9*Cin, Cout_p)    combined folded weight (conv1@pool + conv2)
    b_ref  : (1, Cout_p)        combined folded bias (f32)
    z_ref  : (1, 1, Cout_p)     precomputed SE gate sigmoid(conv3(gap(x))) (f32)
    out_ref: (1, TILE, Cout_p)
    """
    # Single MXU matmul, f32 accumulation.
    acc = jnp.dot(cp_ref[0], w_ref[...], preferred_element_type=jnp.float32)
    a = acc + b_ref[...]                 # (TILE, Cout_p) + (1, Cout_p)
    bv = a * z_ref[0]                    # SE gate
    out_ref[0] = (bv * jax.nn.sigmoid(bv)).astype(out_ref.dtype)   # SiLU


# --------------------------------------------------------------------------- #
# Parameter folding (wrapper-side glue, tiny tensors).
# --------------------------------------------------------------------------- #
def fold_params(raw, eps=1e-5):
    """raw = (W1,g1,be1,m1,v1, W2,g2,be2,m2,v2, W3,bias3) in PyTorch layouts."""
    W1, g1, be1, m1, v1, W2, g2, be2, m2, v2, W3, bias3 = raw
    Cout, Cin = W1.shape[0], W1.shape[1]

    # conv1 (1x1) + BN1, eval mode.
    s1 = g1 / jnp.sqrt(v1 + eps)
    w1 = W1[:, :, 0, 0].T * s1[None, :]                       # (Cin, Cout)
    b1 = be1 - m1 * s1                                        # (Cout,)

    # conv2 (3x3, stride 2, pad 1) + BN2, eval mode, as (kh,kw,Cin,Cout).
    s2 = g2 / jnp.sqrt(v2 + eps)
    w2 = jnp.transpose(W2, (2, 3, 1, 0)).reshape(9 * Cin, Cout) * s2[None, :]
    b2 = be2 - m2 * s2

    # Fuse conv1-on-avgpool into the im2col matmul: the 2x2 pool window of
    # output (i,j) is exactly conv taps (kh,kw) in {1,2}x{1,2} -> indices
    # 4,5,7,8 (row-major).  Fold the 0.25 pool scale into w1 as well.
    w_comb = w2.reshape(9, Cin, Cout)
    for tap in (4, 5, 7, 8):
        w_comb = w_comb.at[tap].add(0.25 * w1)
    w_comb = w_comb.reshape(9 * Cin, Cout)

    return dict(
        w=w_comb,                       # (9*Cin, Cout)
        b=(b1 + b2)[None, :],           # (1, Cout)   combined bias
        w3=W3[:, :, 0, 0].T,            # (Cin, Cout) conv3 (has bias)
        b3=bias3[None, :],              # (1, Cout)
    )


# --------------------------------------------------------------------------- #
# Wrapper: im2col + spatial tiling + pallas_call.
# --------------------------------------------------------------------------- #
def downsampling_block(x, folded, *, compute_dtype=jnp.bfloat16,
                       spatial_tile=1024):
    """x: (N, H, W, Cin) NHWC.  Returns (N, H//2, W//2, Cout) in x.dtype."""
    N, H, W, Cin = x.shape
    assert H % 2 == 0 and W % 2 == 0, "Downsampling_block requires even H, W"
    Ho, Wo = H // 2, W // 2
    rows = Ho * Wo
    w, b, w3, b3 = folded["w"], folded["b"], folded["w3"], folded["b3"]
    Cout = w.shape[1]
    out_dtype = x.dtype

    # Lane-dense output: pad Cout up to a multiple of 128 (unmasked stores,
    # full MXU columns).  Extra lanes are sliced off afterwards.
    Cout_p = -(-Cout // 128) * 128
    pad_c = Cout_p - Cout

    # --- SE branch (trivial FLOPs): z = sigmoid(conv3(global_avg_pool(x))) ---
    z = jax.nn.sigmoid(x.mean(axis=(1, 2)).astype(jnp.float32) @ w3 + b3)
    z = jnp.pad(z, ((0, 0), (0, pad_c)))[:, None, :]          # (N, 1, Cout_p)

    # --- im2col for the fused 3x3/stride-2/pad-1 matmul (layout glue) ---
    xpad = jnp.pad(x, ((0, 0), (1, 1), (1, 1), (0, 0)))
    taps = [xpad[:, kh:kh + 2 * Ho:2, kw:kw + 2 * Wo:2, :]
            for kh in range(3) for kw in range(3)]
    cp = jnp.concatenate(taps, axis=-1).reshape(N, rows, 9 * Cin)

    # --- spatial tiling (bounded VMEM, real pipelining, megacore sharding) ---
    if rows <= spatial_tile:
        tile = rows                               # full-extent block is allowed
    else:
        tile = max(16, (spatial_tile // 16) * 16) # sublane-aligned for bf16
    rows_p = -(-rows // tile) * tile
    if rows_p != rows:
        cp = jnp.pad(cp, ((0, 0), (0, rows_p - rows), (0, 0)))
    n_tiles = rows_p // tile

    # --- dtypes: bf16 matmul inputs, f32 accumulation + elementwise math ---
    cp = cp.astype(compute_dtype)
    w_p = jnp.pad(w, ((0, 0), (0, pad_c))).astype(compute_dtype)
    b_p = jnp.pad(b, ((0, 0), (0, pad_c))).astype(jnp.float32)
    z = z.astype(jnp.float32)

    # --- explicit VMEM budget (double-buffered streams + resident weights) ---
    in_i = jnp.dtype(compute_dtype).itemsize
    out_i = jnp.dtype(out_dtype).itemsize
    vmem_bytes = (2 * tile * 9 * Cin * in_i          # cp, double-buffered
                  + 2 * tile * Cout_p * out_i        # out, double-buffered
                  + 9 * Cin * Cout_p * in_i          # weight
                  + 4 * Cout_p * 4)                  # bias + z
    vmem_limit = int(min(max(4 * vmem_bytes, 16 << 20), 48 << 20))

    out = pl.pallas_call(
        _downsample_kernel,
        out_shape=jax.ShapeDtypeStruct((N, rows_p, Cout_p), out_dtype),
        grid=(N, n_tiles),
        in_specs=[
            pl.BlockSpec((1, tile, 9 * Cin), lambda n, s: (n, s, 0)),
            pl.BlockSpec((9 * Cin, Cout_p), lambda n, s: (0, 0)),
            pl.BlockSpec((1, Cout_p), lambda n, s: (0, 0)),
            pl.BlockSpec((1, 1, Cout_p), lambda n, s: (n, 0, 0)),
        ],
        out_specs=pl.BlockSpec((1, tile, Cout_p), lambda n, s: (n, s, 0)),
        compiler_params=pltpu.CompilerParams(
            dimension_semantics=("parallel", "parallel"),
            vmem_limit_bytes=vmem_limit),
    )(cp, w_p, b_p, z)

    return out[:, :rows, :Cout].reshape(N, Ho, Wo, Cout)


# --------------------------------------------------------------------------- #
# Pure-JAX (XLA) reference with the same eval-mode BN semantics.
# --------------------------------------------------------------------------- #
def reference_forward(x, raw, eps=1e-5):
    W1, g1, be1, m1, v1, W2, g2, be2, m2, v2, W3, bias3 = raw
    N, H, W, Cin = x.shape

    xp = x.reshape(N, H // 2, 2, W // 2, 2, Cin).mean(axis=(2, 4))  # avgpool 2x2
    w1_hwio = jnp.transpose(W1, (2, 3, 1, 0))                       # (1,1,Cin,Cout)
    x1 = lax.conv_general_dilated(xp, w1_hwio, (1, 1), "VALID",
                                  dimension_numbers=("NHWC", "HWIO", "NHWC"))
    x1 = (x1 - m1) / jnp.sqrt(v1 + eps) * g1 + be1

    w2_hwio = jnp.transpose(W2, (2, 3, 1, 0))                       # (3,3,Cin,Cout)
    y = lax.conv_general_dilated(x, w2_hwio, (2, 2), ((1, 1), (1, 1)),
                                 dimension_numbers=("NHWC", "HWIO", "NHWC"))
    y = (y - m2) / jnp.sqrt(v2 + eps) * g2 + be2

    z = x.mean(axis=(1, 2), keepdims=True)                          # (N,1,1,Cin)
    z = jnp.einsum("nhwc,oc->nhwo", z, W3[:, :, 0, 0]) + bias3
    z = jax.nn.sigmoid(z)

    a = x1 + y
    b = a * z
    return b * jax.nn.sigmoid(b)


if __name__ == "__main__":
    N, Cin, Cout, H, W = 2, 4, 8, 16, 16
    eps = 1e-5

    ks = jax.random.split(jax.random.PRNGKey(0), 13)
    x = jax.random.normal(ks[0], (N, H, W, Cin), jnp.float32)

    # Deterministic synthetic parameters (matching the PyTorch module shapes).
    W1 = 0.5 * jax.random.normal(ks[1], (Cout, Cin, 1, 1), jnp.float32)
    g1 = 1.0 + 0.1 * jax.random.normal(ks[2], (Cout,), jnp.float32)
    be1 = 0.1 * jax.random.normal(ks[3], (Cout,), jnp.float32)
    m1 = 0.1 * jax.random.normal(ks[4], (Cout,), jnp.float32)
    v1 = 0.5 + 0.5 * jnp.abs(jax.random.normal(ks[5], (Cout,), jnp.float32))

    W2 = 0.2 * jax.random.normal(ks[6], (Cout, Cin, 3, 3), jnp.float32)
    g2 = 1.0 + 0.1 * jax.random.normal(ks[7], (Cout,), jnp.float32)
    be2 = 0.1 * jax.random.normal(ks[8], (Cout,), jnp.float32)
    m2 = 0.1 * jax.random.normal(ks[9], (Cout,), jnp.float32)
    v2 = 0.5 + 0.5 * jnp.abs(jax.random.normal(ks[10], (Cout,), jnp.float32))

    W3 = 0.5 * jax.random.normal(ks[11], (Cout, Cin, 1, 1), jnp.float32)
    bias3 = 0.1 * jax.random.normal(ks[12], (Cout,), jnp.float32)

    raw = (W1, g1, be1, m1, v1, W2, g2, be2, m2, v2, W3, bias3)
    folded = fold_params(raw, eps=eps)
    ref = reference_forward(x, raw, eps=eps)

    # bf16 matmul-input path (production config).
    out_bf16 = downsampling_block(x, folded, compute_dtype=jnp.bfloat16)
    out_bf16 = jax.block_until_ready(out_bf16)
    assert out_bf16.shape == (N, H // 2, W // 2, Cout), out_bf16.shape
    assert jnp.allclose(out_bf16, ref, atol=5e-2, rtol=5e-2), \
        float(jnp.max(jnp.abs(out_bf16 - ref)))

    # f32 path sanity check.
    out_f32 = downsampling_block(x, folded, compute_dtype=jnp.float32)
    out_f32 = jax.block_until_ready(out_f32)
    assert jnp.allclose(out_f32, ref, atol=5e-2, rtol=5e-2), \
        float(jnp.max(jnp.abs(out_f32 - ref)))

    print("KERNEL_OK")
</pallas_src>

<mosaic_0001>
module attributes {stable_mosaic.version = 11 : i64} {
  func.func @_downsample_kernel(%arg0: i32, %arg1: i32, %arg2: memref<1x64x36xbf16, #tpu.memory_space<vmem>>, %arg3: memref<36x128xbf16, #tpu.memory_space<vmem>>, %arg4: memref<1x128xf32, #tpu.memory_space<vmem>>, %arg5: memref<1x1x128xf32, #tpu.memory_space<vmem>>, %arg6: memref<1x64x128xf32, #tpu.memory_space<vmem>>) attributes {dimension_semantics = [#tpu.dimension_semantics<parallel>, #tpu.dimension_semantics<parallel>], iteration_bounds = array<i64: 2, 1>, scalar_prefetch = 0 : i64, scratch_operands = 0 : i64, tpu.core_type = #tpu.core_type<tc>, window_params = [{transform_indices = @transform_0, window_bounds = array<i64: 1, 64, 36>}, {pipeline_mode = #tpu.pipeline_mode<synchronous>, transform_indices = @transform_1, window_bounds = array<i64: 36, 128>}, {pipeline_mode = #tpu.pipeline_mode<synchronous>, transform_indices = @transform_2, window_bounds = array<i64: 1, 128>}, {transform_indices = @transform_3, window_bounds = array<i64: 1, 1, 128>}, {transform_indices = @transform_4, window_bounds = array<i64: 1, 64, 128>}]} {
    %c0 = arith.constant 0 : index
    %c0_0 = arith.constant 0 : index
    %c0_1 = arith.constant 0 : index
    %0 = vector.load %arg2[%c0, %c0_0, %c0_1] : memref<1x64x36xbf16, #tpu.memory_space<vmem>>, vector<1x64x36xbf16>
    %1 = vector.shape_cast %0 : vector<1x64x36xbf16> to vector<64x36xbf16>
    %c0_2 = arith.constant 0 : index
    %c0_3 = arith.constant 0 : index
    %2 = vector.load %arg3[%c0_2, %c0_3] : memref<36x128xbf16, #tpu.memory_space<vmem>>, vector<36x128xbf16>
    %cst = arith.constant dense<0.000000e+00> : vector<64x128xf32>
    %3 = tpu.matmul %1, %2, %cst {dimension_numbers = #tpu.dot_dimension_numbers<[1], [0], [0], [1], [0, 0, 1, 1], [], []>} : vector<64x36xbf16>, vector<36x128xbf16>, vector<64x128xf32> -> vector<64x128xf32>
    %c0_4 = arith.constant 0 : index
    %c0_5 = arith.constant 0 : index
    %4 = vector.load %arg4[%c0_4, %c0_5] : memref<1x128xf32, #tpu.memory_space<vmem>>, vector<1x128xf32>
    %5 = vector.broadcast %4 : vector<1x128xf32> to vector<64x128xf32>
    %6 = arith.addf %3, %5 : vector<64x128xf32>
    %c0_6 = arith.constant 0 : index
    %c0_7 = arith.constant 0 : index
    %c0_8 = arith.constant 0 : index
    %7 = vector.load %arg5[%c0_6, %c0_7, %c0_8] : memref<1x1x128xf32, #tpu.memory_space<vmem>>, vector<1x1x128xf32>
    %8 = vector.shape_cast %7 : vector<1x1x128xf32> to vector<1x128xf32>
    %9 = vector.broadcast %8 : vector<1x128xf32> to vector<64x128xf32>
    %10 = arith.mulf %6, %9 : vector<64x128xf32>
    %11 = arith.negf %10 : vector<64x128xf32>
    %12 = math.exp %11 : vector<64x128xf32>
    %cst_9 = arith.constant 1.000000e+00 : f32
    %13 = vector.broadcast %cst_9 : f32 to vector<64x128xf32>
    %14 = arith.addf %13, %12 : vector<64x128xf32>
    %15 = arith.divf %13, %14 : vector<64x128xf32>
    %16 = arith.mulf %10, %15 : vector<64x128xf32>
    %c0_10 = arith.constant 0 : index
    %c0_11 = arith.constant 0 : index
    %c0_12 = arith.constant 0 : index
    %17 = vector.load %arg6[%c0_10, %c0_11, %c0_12] : memref<1x64x128xf32, #tpu.memory_space<vmem>>, vector<1x64x128xf32>
    %18 = vector.shape_cast %17 : vector<1x64x128xf32> to vector<64x128xf32>
    %19 = vector.shape_cast %16 : vector<64x128xf32> to vector<1x64x128xf32>
    tpu.vector_store %arg6[%c0_10, %c0_11, %c0_12], %19 {strides = array<i32>} : memref<1x64x128xf32, #tpu.memory_space<vmem>>, vector<1x64x128xf32>,
    return
  }
  func.func @transform_0(%arg0: i32, %arg1: i32) -> (i32, i32, i32) {
    %c0_i32 = arith.constant 0 : i32
    %c0_i32_0 = arith.constant 0 : i32
    return %arg0, %arg1, %c0_i32 : i32, i32, i32
  }
  func.func @transform_1(%arg0: i32, %arg1: i32) -> (i32, i32) {
    %c0_i32 = arith.constant 0 : i32
    %c0_i32_0 = arith.constant 0 : i32
    %c0_i32_1 = arith.constant 0 : i32
    return %c0_i32, %c0_i32_0 : i32, i32
  }
  func.func @transform_2(%arg0: i32, %arg1: i32) -> (i32, i32) {
    %c0_i32 = arith.constant 0 : i32
    %c0_i32_0 = arith.constant 0 : i32
    %c0_i32_1 = arith.constant 0 : i32
    return %c0_i32, %c0_i32_0 : i32, i32
  }
  func.func @transform_3(%arg0: i32, %arg1: i32) -> (i32, i32, i32) {
    %c0_i32 = arith.constant 0 : i32
    %c0_i32_0 = arith.constant 0 : i32
    %c0_i32_1 = arith.constant 0 : i32
    return %arg0, %c0_i32, %c0_i32_0 : i32, i32, i32
  }
  func.func @transform_4(%arg0: i32, %arg1: i32) -> (i32, i32, i32) {
    %c0_i32 = arith.constant 0 : i32
    %c0_i32_0 = arith.constant 0 : i32
    return %arg0, %arg1, %c0_i32 : i32, i32, i32
  }
}

</mosaic_0001>

<bundles_post_ra>
// kernel: tpu_custom_call.1
= control target key start
LH: loop header
LB: loop body
LE: loop exit
PB: predicated region body
PF: predicated region fallthrough
CT: control target
= control target key end

     0   :  { %9 = vsyncpa [#allocation3], 0  ;;  %s969_s0 = inlined_call_operand.vmem [shape: bf16[2,64,36], index: 0, kind: input, shape index: {}]   ;;  %s970_s1 = inlined_call_operand.vmem [shape: bf16[36,128], index: 1, kind: input, shape index: {}]   ;;  %s971_s2 = inlined_call_operand.vmem [shape: f32[1,128], index: 2, kind: input, shape index: {}]   ;;  %s972_s3 = inlined_call_operand.vmem [shape: f32[2,1,128], index: 3, kind: input, shape index: {}]   ;;  %s973_s4 = inlined_call_operand.hbm [shape: f32[2,64,128], index: 4, kind: output, shape index: {}]  }
   0x1   :  { %11 = vsyncpa [#allocation3 + $0x1], 0  ;;  %s831_s15 = smov 0   ;;  %s833_s16 = smov 0  }
   0x2   :  { %s835_s17 = smov 0   ;;  %s837_s18 = smov 0  }
   0x3   :  { %s839_s19 = smov 0   ;;  %s841_s20 = smov 0  }
   0x4 LB: > { %s562_s21 = sadd.s32 4294967295, %s801_s20   ;;  %s563_s22 = sadd.s32 4294967294, %s801_s20   ;;  %s801_s20 = sphi %s841_s20, %s17_s20   ;;  %s797_s19 = sphi %s839_s19, %s980_s19   ;;  %s793_s18 = sphi %s837_s18, %s979_s18   ;;  %s789_s17 = sphi %s835_s17, %s978_s17   ;;  %s785_s16 = sphi %s833_s16, %s977_s16   ;;  %s781_s15 = sphi %s831_s15, %s976_s15  }
   0x5   : > { %s29_s23 = sadd.s32 1, %s797_s19  ;;  %s134_s24 = sadd.s32 1, %s789_s17 }
   0x6   : > { %p31_p0 = scmp.ge.s32.totalorder %s29_s23, 2  ;;  %p144_p1 = scmp.ne.s32.totalorder %s789_s17, %s785_s16 }
   0x7   : > { %p145_p2 = scmp.eq.s32.totalorder %s562_s21, 1  ;;  %p150_p3 = scmp.ne.s32.totalorder %s785_s16, %s781_s15 }
   0x8   : > { %s982_s23 = smov (%p31_p0, %s29_s23), 0  ;;  %p151_p5 = scmp.eq.s32.totalorder %s563_s22, 1 }
   0x9   : > { %p871_p4 = por %p145_p2, %p144_p1  ;;  %s129_s26 = ssub.s32 %s797_s19, %s982_s23 }
   0xa   : > { %p566_p6 = scmp.ge.s32.totalorder %s801_s20, 1  ;;  %p132_p7 = scmp.eq.s32.totalorder %s129_s26, 0 }
   0xb   : > { %p878_p8 = por %p151_p5, %p150_p3  ;;  %p194_p9 = scmp.lt.s32.totalorder %s801_s20, 3 }
   0xc   : > { %s884_s28 = scalar_select %p132_p7, %s789_s17, %s134_s24  }
   0xd   : > { %p195_p10 = pnand %p566_p6, %p194_p9 }
   0xe   : > { %v684_v0 = vld [vmem:[%s970_s1] sm:$0xff] (!%p195_p10)   ;;  %v685_v1 = vld [vmem:[%s970_s1 + $0x8] sm:$0xff] (!%p195_p10)   ;;  %p228_p11 = scmp.lt.s32.totalorder (!%p195_p10), %s793_s18, 1  ;;  %v686_v2 = vld [vmem:[%s970_s1 + $0x10] ss:$0 sps:$4 sm:$0x33] (!%p195_p10)  }
   0xf   : > { %198 = sbr.rel (%p195_p10) target bundleno = 294 (0x126), region = 36  ;;  %605 = vmatprep.subr.bf16.mxu0 (!%p195_p10), %v684_v0  ;;  %619 = vmatprep.subr.bf16.mxu1 (!%p195_p10), %v684_v0  ;;  %vm310_vm0 = vcmask (!%p195_p10), 1041408   ;;  %vm297_vm1 = vcmask (!%p195_p10), 293888   ;;  %v570_v8 = vld [vmem:[%s971_s2] ss:$0 sm:$0xff] (!%p195_p10)  ;;  %s224_s29 = sand.u32 (!%p195_p10), 1, %s785_s16  }
  0x10   : > { %606 = vmatpush3.bf16.msra.mxu0 (!%p195_p10), %v684_v0  ;;  %622 = vmatpush3.bf16.msra.mxu1 (!%p195_p10), %v684_v0  ;;  %v312_v4 = vsel (!%p195_p10), %vm310_vm0, %v686_v2, 0  ;;  %s567_s30 = sshll.u32 (!%p195_p10), %s224_s29, 6  ;;  %s597_s6 = sshll.u32 (!%p195_p10), %s793_s18, 10 }
  0x11   : > { %607 = vmatprep.subr.bf16.mxu0 (!%p195_p10), %v685_v1  ;;  %620 = vmatprep.subr.bf16.mxu1 (!%p195_p10), %v685_v1  ;;  %s226_s5 = scalar_lea.vmem (!%p195_p10), [#allocation2], %s567_s30  ;;  %s803_s12 = smov (!%p195_p10), [#allocation2]  }
  0x14   : > { %608 = vmatpush3.bf16.msra.mxu0 (!%p195_p10), %v685_v1  ;;  %623 = vmatpush3.bf16.msra.mxu1 (!%p195_p10), %v685_v1 }
  0x15   : > { %625 = vmatprep.subr.msk.bf16.mxu0 (!%p195_p10), %vm310_vm0, %v686_v2  ;;  %626 = vmatprep.subr.msk.bf16.mxu1 (!%p195_p10), %vm310_vm0, %v686_v2 }
  0x16   : > { %s229_s7 = scalar_select %p228_p11, %s793_s18, 1 }
  0x17   : > { %s923_s18 = scalar_lea.sflag [#allocation3], %s224_s29 }
  0x18   : > { %s596_s10 = sshll.u32 %s229_s7, 5  ;;  %610 = vmatpush3.bf16.msra.mxu0 %v312_v4  ;;  %624 = vmatpush3.bf16.msra.mxu1 %v312_v4  ;;  %s239_s22 = scalar_lea.vmem %s972_s3, %s229_s7 }
  0x19   : > { %s235_s13 = scalar_lea.vmem %s969_s0, %s596_s10  ;;  %v582_v10 = vld [vmem:[%s239_s22] ss:$0 sm:$0xff]  ;;  %s474_s7 = sshll.u32 %s226_s5, 4  ;;  %s918_s7 = int_to_ptr.vmem [resolvable:$true] %s474_s7 }
  0x1a   : > { %v687_v3 = vld [vmem:[%s235_s13] sm:$0xff]   ;;  %v688_v5 = vld [vmem:[%s235_s13 + $0x10] sm:$0xff]   ;;  %v689_v6 = vld [vmem:[%s235_s13 + $0x8] sm:$0xff]   ;;  %s916_s10 = scalar_lea.hbm %s973_s4, %s597_s6  ;;  %s723_s11 = scalar_lea.vmem %s918_s7, 1024 }
  0x1b   : > { %611 = vmatprep.mubr.msk.bf16.mxu0 %vm297_vm1, %v687_v3  ;;  %615 = vmatprep.mubr.msk.bf16.mxu1 %vm297_vm1, %v688_v5  ;;  %v690_v7 = vld [vmem:[%s235_s13 + $0x18] sm:$0xff]   ;;  %p724_p12 = scmp.ne.s32.totalorder %s918_s7, %s723_s11  ;;  %s727_s13 = sshll.u32 %s803_s12, 4  ;;  %s728_s13 = int_to_ptr.vmem [resolvable:$false] %s727_s13 }
  0x1c   : > { %612 = vmatmul.mubr.msk.bf16.vlgmr.msra.gmra.mrb[0].mxu0 %vm297_vm1, %v689_v6  ;;  %616 = vmatmul.mubr.msk.bf16.vlgmr.msra.gmra.mrb[0].mxu1 %vm297_vm1, %v690_v7  ;;  %s729_s14 = scalar_lea.vmem %s728_s13, 2048  ;;  %p730_p1 = scmp.lt.s32.totalorder %s918_s7, %s728_s13 }
  0x1d   : > { %p725_p13 = pnand %p724_p12, %p871_p4  ;;  %p731_p2 = scmp.lt.s32.totalorder %s729_s14, %s723_s11 }
  0x1f   : > { %p726_p0 = pneg %p725_p13  ;;  %p732_p3 = por %p731_p2, %p730_p1 }
  0x21   : > { %p733_p5 = pnand %p732_p3, %p726_p0 }
  0xef   : > { %v613_v9 = vpop.f32.mrb[0].mxu0  ;;  %v617_v11 = vpop.f32.mrb[0].mxu1 }
  0xf0   : > { %v357_v12 = vadd.f32 %v613_v9, %v570_v8  ;;  %v373_v13 = vadd.f32 %v617_v11, %v570_v8  ;;  %v348_v14 = vpop.f32.mrb[1].mxu0  ;;  %v364_v15 = vpop.f32.mrb[1].mxu1 }
  0xf1   : > { %v349_v16 = vadd.f32 %v570_v8, %v348_v14  ;;  %v365_v17 = vadd.f32 %v570_v8, %v364_v15  ;;  %v614_v18 = vpop.f32.mrb[2].mxu0  ;;  %v618_v19 = vpop.f32.mrb[2].mxu1 }
  0xf2   : > { %v388_v20 = vmul.f32 %v582_v10, %v357_v12  ;;  %v392_v21 = vmul.f32 %v582_v10, %v373_v13  ;;  %v360_v22 = vadd.f32 %v614_v18, %v570_v8  ;;  %v376_v23 = vadd.f32 %v618_v19, %v570_v8  ;;  %v351_v24 = vpop.f32.mrb[3].mxu0  ;;  %v367_v25 = vpop.f32.mrb[3].mxu1 }
  0xf3   : > { %v386_v26 = vmul.f32 %v582_v10, %v349_v16  ;;  %v390_v27 = vmul.f32 %v582_v10, %v365_v17  ;;  %v352_v28 = vadd.f32 %v570_v8, %v351_v24  ;;  %v368_v29 = vadd.f32 %v570_v8, %v367_v25 }
  0xf4   : > { %v585_v30 = vmul.f32 -1.442695, %v388_v20  ;;  %v589_v31 = vmul.f32 -1.442695, %v392_v21  ;;  %v389_v32 = vmul.f32 %v582_v10, %v360_v22  ;;  %v393_v33 = vmul.f32 %v582_v10, %v376_v23 }
  0xf5   : > { %v583_v34 = vmul.f32 -1.442695, %v386_v26  ;;  %v587_v35 = vmul.f32 -1.442695, %v390_v27  ;;  %v387_v36 = vmul.f32 %v582_v10, %v352_v28  ;;  %v906_v37 = vmul.f32 %v582_v10, %v368_v29 }
  0xf6   : > { %691 = vpow2.f32 %v585_v30  ;;  %v586_v38 = vmul.f32 -1.442695, %v389_v32  ;;  %v590_v39 = vmul.f32 -1.442695, %v393_v33 }
  0xf7   : > { %693 = vpow2.f32 %v589_v31  ;;  %v584_v40 = vmul.f32 -1.442695, %v387_v36  ;;  %v588_v41 = vmul.f32 -1.442695, %v906_v37 }
  0xf8   : > { %695 = vpow2.f32 %v583_v34 }
  0xf9   : > { %697 = vpow2.f32 %v587_v35 }
  0xfa   : > { %699 = vpow2.f32 %v586_v38 }
  0xfb   : > { %701 = vpow2.f32 %v590_v39 }
  0xfc   : > { %703 = vpow2.f32 %v584_v40 }
  0xfd   : > { %705 = vpow2.f32 %v588_v41 }
 0x100   : > { %v692_v42 = vpop.eup %691 }
 0x101   : > { %v694_v43 = vpop.eup %693  ;;  %v420_v44 = vadd.f32 1.0, %v692_v42 }
 0x102   : > { %v696_v45 = vpop.eup %695  ;;  %v424_v46 = vadd.f32 1.0, %v694_v43 }
 0x103   : > { %v698_v47 = vpop.eup %697  ;;  %707 = vrcp.f32 %v420_v44  ;;  %v418_v48 = vadd.f32 1.0, %v696_v45 }
 0x104   : > { %v700_v49 = vpop.eup %699  ;;  %709 = vrcp.f32 %v424_v46  ;;  %v422_v50 = vadd.f32 1.0, %v698_v47 }
 0x105   : > { %v702_v51 = vpop.eup %701  ;;  %711 = vrcp.f32 %v418_v48  ;;  %v421_v52 = vadd.f32 1.0, %v700_v49 }
 0x106   : > { %v704_v53 = vpop.eup %703  ;;  %713 = vrcp.f32 %v422_v50  ;;  %v425_v54 = vadd.f32 1.0, %v702_v51 }
 0x107   : > { %v706_v55 = vpop.eup %705  ;;  %715 = vrcp.f32 %v421_v52  ;;  %v419_v56 = vadd.f32 1.0, %v704_v53 }
 0x108   : > { %717 = vrcp.f32 %v425_v54  ;;  %v423_v57 = vadd.f32 1.0, %v706_v55 }
 0x109   : > { %719 = vrcp.f32 %v419_v56 }
 0x10a   : > { %721 = vrcp.f32 %v423_v57 }
 0x10d   : > { %v708_v58 = vpop.eup %707 }
 0x10e   : > { %v710_v59 = vpop.eup %709  ;;  %v444_v60 = vmul.f32 %v708_v58, %v388_v20 }
 0x10f   : > { %v712_v61 = vpop.eup %711  ;;  %v448_v62 = vmul.f32 %v710_v59, %v392_v21 }
 0x110   : > { %v714_v63 = vpop.eup %713  ;;  %452 = vst [vmem:[%s226_s5 + $0x10] sm:$0xff] %v444_v60  ;;  %v442_v0 = vmul.f32 %v712_v61, %v386_v26 }
 0x111   : > { %v716_v1 = vpop.eup %715  ;;  %456 = vst [vmem:[%s226_s5 + $0x30] sm:$0xff] %v448_v62  ;;  %v446_v2 = vmul.f32 %v714_v63, %v390_v27 }
 0x112   : > { %v718_v3 = vpop.eup %717  ;;  %450 = vst [vmem:[%s226_s5] sm:$0xff] %v442_v0  ;;  %v445_v4 = vmul.f32 %v716_v1, %v389_v32 }
 0x113   : > { %v720_v5 = vpop.eup %719  ;;  %454 = vst [vmem:[%s226_s5 + $0x20] sm:$0xff] %v446_v2  ;;  %v449_v6 = vmul.f32 %v718_v3, %v393_v33 }
 0x114   : > { %v722_v7 = vpop.eup %721  ;;  %453 = vst [vmem:[%s226_s5 + $0x18] sm:$0xff] %v445_v4  ;;  %v443_v8 = vmul.f32 %v720_v5, %v387_v36 }
 0x115   : > { %457 = vst [vmem:[%s226_s5 + $0x38] sm:$0xff] %v449_v6  ;;  %v447_v9 = vmul.f32 %v722_v7, %v906_v37 }
 0x116   : > { %451 = vst [vmem:[%s226_s5 + $0x8] sm:$0xff] %v443_v8 }
 0x117   : > { %455 = vst [vmem:[%s226_s5 + $0x28] sm:$0xff] %v447_v9 }
 0x118   : > { %736 = shalt.err (!%p733_p5)
}
 0x119   : > { %s737_s21 = scalar_lea.hbm %s916_s10, 1024  ;;  %s741_s26 = scalar_lea.hbm %s973_s4, 2048 }
 0x11a   : > { %p738_p6 = scmp.ne.s32.totalorder %s916_s10, %s737_s21  ;;  %p742_p10 = scmp.lt.u32.totalorder %s916_s10, %s973_s4 }
 0x11b   : > { %p743_p11 = scmp.lt.u32.totalorder %s741_s26, %s737_s21  ;;  %p745_p13 = scmp.lt.u32.totalorder %s737_s21, %s916_s10 }
 0x11c   : > { %p739_p7 = pnand %p738_p6, %p871_p4 }
 0x11d   : > { %p744_p12 = por %p743_p11, %p742_p10 }
 0x11e   : > { %p740_p9 = pneg %p739_p7 }
 0x11f   : > { %p746_p0 = por %p745_p13, %p744_p12 }
 0x121   : > { %p747_p1 = pnand %p746_p0, %p740_p9 }
 0x123   : > { %750 = shalt.err (!%p747_p1)
}
 0x124   : > { %s804_s5 = smov 128   ;;  %s805_s6 = smov 8  }
 0x125   : > { %627 = dma.vmem_to_hbm [thread:$0]  (%p871_p4), %s918_s7, 1024, %s916_s10, %s923_s18, %s804_s5, %s804_s5, %s805_s6  }
 0x126 PF: > { %p633_p2 = scmp.ge.s32.totalorder %s801_s20, 2  ;;  %s489_s8 = sand.u32 1, %s781_s15  }
 0x127   : > { %s490_s9 = scalar_lea.sflag [#allocation3], %s489_s8 }
 0x128   : > { %p630_p3 = pnand %p633_p2, %p878_p8 }
 0x12a   : > { %776 = dma.done.wait (!%p630_p3), %s490_s9, 1024  }
 0x12b   : > { %778 = vsyncadd (!%p630_p3), %s490_s9, 4294966272  ;;  %s17_s20 = sadd.s32 1, %s801_s20   ;;  %s976_s15 = smov %s785_s16 }
 0x12c   : > { %p14_p5 = scmp.ge.s32.totalorder %s17_s20, 4   ;;  %s977_s16 = smov %s789_s17 }
 0x12d   : > { %s978_s17 = smov %s884_s28  ;;  %s979_s18 = smov %s797_s19 }
 0x12e   : > { %s980_s19 = smov %s982_s23  ;;  %16 = sbr.rel (!%p14_p5) target bundleno = 4 (0x4), region = 74 }
 0x135   :  { %495 = vsyncpa [#allocation3], 1 }
 0x136   :  { %497 = vsyncpa [#allocation3 + $0x1], 1 }

</bundles_post_ra>
